<compile_context>
chip_gen: v7x
topology: tpu7x:2x2x1
jax: 0.10.0
libtpu: 0.0.40
codegen_flags: <defaults>
</compile_context>

<pallas_src>
import functools

import numpy as np
import jax
import jax.numpy as jnp
from jax.experimental import pallas as pl
from jax.experimental.pallas import tpu as pltpu

LRELU_SLOPE = 0.1


# ----------------------------------------------------------------------------
# Pallas kernel: fused  leaky_relu -> dilated conv1d (+bias) -> +residual
# ----------------------------------------------------------------------------


def _fused_resconv_kernel(x_act_ref, x_res_ref, w_ref, b_ref, o_ref, stage_ref,
                          *, K, dilation, pad, L, Cin, negative_slope):
    # x_act_ref: (1, Cin, L)      f32   unpadded input (activation source)
    # x_res_ref: (1, TCO, L)      f32   lane-aligned residual tile (same array)
    # w_ref:     (TCO, KC_pad)    bf16  K-folded weights, contraction on lanes
    # b_ref:     (TCO, 1)         f32   conv bias
    # o_ref:     (1, TCO, L)      f32   NCL output tile, L on lanes
    # stage_ref: (KC_pad, L)      bf16  per-batch staging scratch (carried)
    co = pl.program_id(1)

    # Once per batch (co == 0): leaky_relu + bf16 cast + K-tap fold into the
    # staging slab.  Boundary columns and lane-pad rows are left at zero, so
    # no HBM-side padding of the activation is needed.
    @pl.when(co == 0)
    def _():
        x = x_act_ref[0]                                        # (Cin, L) f32
        xt = jnp.where(x >= 0, x, negative_slope * x).astype(jnp.bfloat16)
        stage_ref[...] = jnp.zeros_like(stage_ref)
        for k in range(K):                                      # K static, small
            off = k * dilation - pad                            # static shift
            row = k * Cin
            if off == 0:
                stage_ref[pl.ds(row, Cin), :] = xt
            elif off > 0:
                stage_ref[pl.ds(row, Cin), pl.ds(0, L - off)] = xt[:, off:]
            else:
                stage_ref[pl.ds(row, Cin), pl.ds(-off, L + off)] = xt[:, :L + off]

    # One wide contraction on the MXU: (TCO, KC_pad) x (KC_pad, L), f32 acc.
    acc = jax.lax.dot_general(
        w_ref[...], stage_ref[...], (((1,), (0,)), ((), ())),
        preferred_element_type=jnp.float32)                     # (TCO, L)

    # VPU epilogue: + conv bias + residual, lane-dense NCL store.
    o_ref[0] = (acc + b_ref[...] + x_res_ref[0]).astype(o_ref.dtype)


def _round_up(n, m):
    return ((n + m - 1) // m) * m


def _preferred_cout_tile(Cout):
    # v6e / v7x MXUs are 256-wide; v5e / v4 are 128-wide.
    try:
        kind = jax.devices()[0].device_kind.lower()
    except Exception:  # pragma: no cover - defensive only
        kind = ""
    wide = 128 if ("v5 lite" in kind or "v5e" in kind or "v4" in kind) else 256
    for t in (wide, 256, 128):
        if Cout % t == 0:
            return t
    return Cout


@functools.partial(jax.jit, static_argnames=("dilation",))
def fused_resconv1d_pallas(x, weight, bias, *, dilation):
    """x + Conv1d_dilated(leaky_relu(x), weight, bias); PyTorch Conv1d semantics."""
    B, Cin, L = x.shape
    Cout, Cin_w, K = weight.shape
    assert Cin == Cin_w and Cout == Cin, "ResBlock2 conv is channels->channels"
    pad = dilation * (K - 1) // 2

    # Trace-time tiling choices (shapes are static under jit).
    TCO = _preferred_cout_tile(Cout)
    n_co = Cout // TCO
    KC = K * Cin
    KC_pad = _round_up(KC, 128)               # full lane-width weight loads

    # Weight / bias prep fuses into this jit (no extra eager dispatches).
    # (Cout, Cin, K) -> (Cout, K, Cin) -> (Cout, K*Cin) -> lane-pad to 128.
    w2 = jnp.transpose(weight, (0, 2, 1)).reshape(Cout, KC)
    w2 = jnp.pad(w2, ((0, 0), (0, KC_pad - KC))).astype(jnp.bfloat16)
    b2 = bias.reshape(Cout, 1).astype(jnp.float32)
    xf = x.astype(jnp.float32)

    # Size the scoped VMEM limit from the actual buffers (v5e default is 16 MiB).
    vmem_need = (
        2 * Cin * L * 4            # activation block (double-buffered)
        + 2 * TCO * L * 4          # residual block
        + 2 * TCO * L * 4          # output block
        + 2 * TCO * KC_pad * 2     # weight tile
        + 2 * TCO * 128 * 4        # bias tile (lane-padded)
        + KC_pad * L * 2           # staging scratch
    )
    vmem_limit = int(min(max(2 * vmem_need, 16 * 1024 * 1024),
                         100 * 1024 * 1024))

    kernel = functools.partial(
        _fused_resconv_kernel, K=K, dilation=dilation, pad=pad, L=L,
        Cin=Cin, negative_slope=LRELU_SLOPE)

    return pl.pallas_call(
        kernel,
        out_shape=jax.ShapeDtypeStruct((B, Cout, L), jnp.float32),
        grid=(B, n_co),
        in_specs=[
            # activation source: block index constant along co (one DMA / batch)
            pl.BlockSpec((1, Cin, L), lambda b, co: (b, 0, 0)),
            # residual: lane-aligned per-co tile of the same (unpadded) array
            pl.BlockSpec((1, TCO, L), lambda b, co: (b, co, 0)),
            # K-folded weight tile
            pl.BlockSpec((TCO, KC_pad), lambda b, co: (co, 0)),
            # conv bias
            pl.BlockSpec((TCO, 1), lambda b, co: (co, 0)),
        ],
        out_specs=pl.BlockSpec((1, TCO, L), lambda b, co: (b, co, 0)),
        scratch_shapes=[pltpu.VMEM((KC_pad, L), jnp.bfloat16)],
        compiler_params=pltpu.CompilerParams(
            # co carries the staging scratch -> must be 'arbitrary'.
            dimension_semantics=("parallel", "arbitrary"),
            vmem_limit_bytes=vmem_limit),
    )(xf, xf, w2, b2)


# ----------------------------------------------------------------------------
# Pure-JAX reference (correctness check only)
# ----------------------------------------------------------------------------


def fused_resconv1d_ref(x, weight, bias, *, dilation):
    K = weight.shape[-1]
    pad = dilation * (K - 1) // 2
    xt = jnp.where(x >= 0, x, LRELU_SLOPE * x)
    conv = jax.lax.conv_general_dilated(
        xt, weight,
        window_strides=(1,),
        padding=[(pad, pad)],
        rhs_dilation=(dilation,),
        dimension_numbers=("NCH", "OIH", "NCH"),
        precision=jax.lax.Precision.HIGHEST,
    )
    return x + conv + bias[None, :, None]


# ----------------------------------------------------------------------------
# ResBlock2 parameters + forward (mirrors the PyTorch module)
# ----------------------------------------------------------------------------


def init_resblock2(key, channels, kernel_size=3, dilations=(1, 3)):
    params = []
    for d in dilations:
        key, kw, kb = jax.random.split(key, 3)
        # init_weights: weight ~ N(0, 0.01); weight_norm at init is the identity
        # reparam (g = ||v||  =>  w_eff == v), so we use v directly.
        w = 0.01 * jax.random.normal(kw, (channels, channels, kernel_size),
                                     jnp.float32)
        bound = 1.0 / np.sqrt(channels * kernel_size)
        b = jax.random.uniform(kb, (channels,), jnp.float32, -bound, bound)
        params.append(dict(w=w, b=b, dilation=d))
    return params


def resblock2_forward(params, x, fused_fn):
    # for c in self.convs: xt = leaky_relu(x); xt = c(xt); x = xt + x
    for layer in params:
        x = fused_fn(x, layer["w"], layer["b"], dilation=layer["dilation"])
    return x


# ----------------------------------------------------------------------------


if __name__ == "__main__":
    key = jax.random.PRNGKey(0)
    k_x, k_p = jax.random.split(key)

    B, C, L = 2, 32, 256          # batch, channels, sequence length
    x = jax.random.normal(k_x, (B, C, L), jnp.float32)

    params = init_resblock2(k_p, channels=C, kernel_size=3, dilations=(1, 3))

    out = resblock2_forward(params, x, fused_resconv1d_pallas)
    out = jax.block_until_ready(out)

    ref = resblock2_forward(params, x, fused_resconv1d_ref)
    err = float(jnp.max(jnp.abs(out - ref)))
    if not np.isfinite(err) or err > 1e-2:
        raise AssertionError(f"Pallas vs reference mismatch: max abs err {err}")

    print("KERNEL_OK")
</pallas_src>

<mosaic_0001>
module attributes {stable_mosaic.version = 11 : i64} {
  func.func @_fused_resconv_kernel(%arg0: i32, %arg1: i32, %arg2: memref<1x32x256xf32, #tpu.memory_space<vmem>>, %arg3: memref<1x32x256xf32, #tpu.memory_space<vmem>>, %arg4: memref<32x128xbf16, #tpu.memory_space<vmem>>, %arg5: memref<32x1xf32, #tpu.memory_space<vmem>>, %arg6: memref<1x32x256xf32, #tpu.memory_space<vmem>>, %arg7: memref<128x256xbf16, #tpu.memory_space<vmem>>) attributes {dimension_semantics = [#tpu.dimension_semantics<parallel>, #tpu.dimension_semantics<arbitrary>], iteration_bounds = array<i64: 2, 1>, scalar_prefetch = 0 : i64, scratch_operands = 1 : i64, tpu.core_type = #tpu.core_type<tc>, window_params = [{transform_indices = @transform_0, window_bounds = array<i64: 1, 32, 256>}, {transform_indices = @transform_1, window_bounds = array<i64: 1, 32, 256>}, {transform_indices = @transform_2, window_bounds = array<i64: 32, 128>}, {transform_indices = @transform_3, window_bounds = array<i64: 32, 1>}, {transform_indices = @transform_4, window_bounds = array<i64: 1, 32, 256>}]} {
    %c0_i32 = arith.constant 0 : i32
    %0 = arith.cmpi eq, %arg1, %c0_i32 : i32
    %1 = arith.extui %0 : i1 to i32
    %c0_i32_0 = arith.constant 0 : i32
    %2 = arith.cmpi ne, %1, %c0_i32_0 : i32
    scf.if %2 {
      %c0_12 = arith.constant 0 : index
      %c0_13 = arith.constant 0 : index
      %c0_14 = arith.constant 0 : index
      %15 = vector.load %arg2[%c0_12, %c0_13, %c0_14] : memref<1x32x256xf32, #tpu.memory_space<vmem>>, vector<1x32x256xf32>
      %16 = vector.shape_cast %15 : vector<1x32x256xf32> to vector<32x256xf32>
      %cst_15 = arith.constant 0.000000e+00 : f32
      %17 = vector.broadcast %cst_15 : f32 to vector<32x256xf32>
      %18 = arith.cmpf oge, %16, %17 : vector<32x256xf32>
      %cst_16 = arith.constant 1.000000e-01 : f32
      %19 = vector.broadcast %cst_16 : f32 to vector<32x256xf32>
      %20 = arith.mulf %19, %16 : vector<32x256xf32>
      %21 = arith.select %18, %16, %20 : vector<32x256xi1>, vector<32x256xf32>
      %22 = arith.truncf %21 : vector<32x256xf32> to vector<32x256xbf16>
      %cst_17 = arith.constant 0.000000e+00 : bf16
      %23 = vector.broadcast %cst_17 : bf16 to vector<128x256xbf16>
      %c0_18 = arith.constant 0 : index
      %c0_19 = arith.constant 0 : index
      %24 = vector.load %arg7[%c0_18, %c0_19] : memref<128x256xbf16, #tpu.memory_space<vmem>>, vector<128x256xbf16>
      tpu.vector_store %arg7[%c0_18, %c0_19], %23 {strides = array<i32>} : memref<128x256xbf16, #tpu.memory_space<vmem>>, vector<128x256xbf16>,
      %25 = vector.extract_strided_slice %22 {offsets = [0, 0], sizes = [32, 255], strides = [1, 1]} : vector<32x256xbf16> to vector<32x255xbf16>
      %c0_20 = arith.constant 0 : index
      %c1 = arith.constant 1 : index
      %26 = vector.load %arg7[%c0_20, %c1] : memref<128x256xbf16, #tpu.memory_space<vmem>>, vector<32x255xbf16>
      tpu.vector_store %arg7[%c0_20, %c1], %25 {strides = array<i32>} : memref<128x256xbf16, #tpu.memory_space<vmem>>, vector<32x255xbf16>,
      %c32 = arith.constant 32 : index
      %c0_21 = arith.constant 0 : index
      %27 = vector.load %arg7[%c32, %c0_21] : memref<128x256xbf16, #tpu.memory_space<vmem>>, vector<32x256xbf16>
      tpu.vector_store %arg7[%c32, %c0_21], %22 {strides = array<i32>} : memref<128x256xbf16, #tpu.memory_space<vmem>>, vector<32x256xbf16>,
      %28 = vector.extract_strided_slice %22 {offsets = [0, 1], sizes = [32, 255], strides = [1, 1]} : vector<32x256xbf16> to vector<32x255xbf16>
      %c64 = arith.constant 64 : index
      %c0_22 = arith.constant 0 : index
      %29 = vector.load %arg7[%c64, %c0_22] : memref<128x256xbf16, #tpu.memory_space<vmem>>, vector<32x255xbf16>
      tpu.vector_store %arg7[%c64, %c0_22], %28 {strides = array<i32>} : memref<128x256xbf16, #tpu.memory_space<vmem>>, vector<32x255xbf16>,
    } else {
    }
    %c0 = arith.constant 0 : index
    %c0_1 = arith.constant 0 : index
    %3 = vector.load %arg4[%c0, %c0_1] : memref<32x128xbf16, #tpu.memory_space<vmem>>, vector<32x128xbf16>
    %c0_2 = arith.constant 0 : index
    %c0_3 = arith.constant 0 : index
    %4 = vector.load %arg7[%c0_2, %c0_3] : memref<128x256xbf16, #tpu.memory_space<vmem>>, vector<128x256xbf16>
    %cst = arith.constant dense<0.000000e+00> : vector<32x256xf32>
    %5 = tpu.matmul %3, %4, %cst {dimension_numbers = #tpu.dot_dimension_numbers<[1], [0], [0], [1], [0, 0, 1, 1], [], []>} : vector<32x128xbf16>, vector<128x256xbf16>, vector<32x256xf32> -> vector<32x256xf32>
    %c0_4 = arith.constant 0 : index
    %c0_5 = arith.constant 0 : index
    %6 = vector.load %arg5[%c0_4, %c0_5] : memref<32x1xf32, #tpu.memory_space<vmem>>, vector<32x1xf32>
    %7 = vector.broadcast %6 : vector<32x1xf32> to vector<32x256xf32>
    %8 = arith.addf %5, %7 : vector<32x256xf32>
    %c0_6 = arith.constant 0 : index
    %c0_7 = arith.constant 0 : index
    %c0_8 = arith.constant 0 : index
    %9 = vector.load %arg3[%c0_6, %c0_7, %c0_8] : memref<1x32x256xf32, #tpu.memory_space<vmem>>, vector<1x32x256xf32>
    %10 = vector.shape_cast %9 : vector<1x32x256xf32> to vector<32x256xf32>
    %11 = arith.addf %8, %10 : vector<32x256xf32>
    %c0_9 = arith.constant 0 : index
    %c0_10 = arith.constant 0 : index
    %c0_11 = arith.constant 0 : index
    %12 = vector.load %arg6[%c0_9, %c0_10, %c0_11] : memref<1x32x256xf32, #tpu.memory_space<vmem>>, vector<1x32x256xf32>
    %13 = vector.shape_cast %12 : vector<1x32x256xf32> to vector<32x256xf32>
    %14 = vector.shape_cast %11 : vector<32x256xf32> to vector<1x32x256xf32>
    tpu.vector_store %arg6[%c0_9, %c0_10, %c0_11], %14 {strides = array<i32>} : memref<1x32x256xf32, #tpu.memory_space<vmem>>, vector<1x32x256xf32>,
    return
  }
  func.func @transform_0(%arg0: i32, %arg1: i32) -> (i32, i32, i32) {
    %c0_i32 = arith.constant 0 : i32
    %c0_i32_0 = arith.constant 0 : i32
    %c0_i32_1 = arith.constant 0 : i32
    return %arg0, %c0_i32, %c0_i32_0 : i32, i32, i32
  }
  func.func @transform_1(%arg0: i32, %arg1: i32) -> (i32, i32, i32) {
    %c0_i32 = arith.constant 0 : i32
    %c0_i32_0 = arith.constant 0 : i32
    return %arg0, %arg1, %c0_i32 : i32, i32, i32
  }
  func.func @transform_2(%arg0: i32, %arg1: i32) -> (i32, i32) {
    %c0_i32 = arith.constant 0 : i32
    %c0_i32_0 = arith.constant 0 : i32
    return %arg1, %c0_i32 : i32, i32
  }
  func.func @transform_3(%arg0: i32, %arg1: i32) -> (i32, i32) {
    %c0_i32 = arith.constant 0 : i32
    %c0_i32_0 = arith.constant 0 : i32
    return %arg1, %c0_i32 : i32, i32
  }
  func.func @transform_4(%arg0: i32, %arg1: i32) -> (i32, i32, i32) {
    %c0_i32 = arith.constant 0 : i32
    %c0_i32_0 = arith.constant 0 : i32
    return %arg0, %arg1, %c0_i32 : i32, i32, i32
  }
}

</mosaic_0001>

<bundles_post_ra>
// kernel: fused_resconv1d_pallas.1
= control target key start
LH: loop header
LB: loop body
LE: loop exit
PB: predicated region body
PF: predicated region fallthrough
CT: control target
= control target key end

     0   :  { %9 = vsyncpa [#allocation4], 0  ;;  %s1059_s0 = inlined_call_operand.vmem [shape: f32[2,32,256], index: 0, kind: input, shape index: {}, may-alias: {0,1}]   ;;  %s1060_s1 = inlined_call_operand.vmem [shape: f32[2,32,256], index: 1, kind: input, shape index: {}, may-alias: {0,1}]   ;;  %s1061_s2 = inlined_call_operand.vmem [shape: bf16[32,128], index: 2, kind: input, shape index: {}]   ;;  %s1062_s3 = inlined_call_operand.vmem [shape: f32[32,1], index: 3, kind: input, shape index: {}]   ;;  %s1063_s4 = inlined_call_operand.hbm [shape: f32[2,32,256], index: 4, kind: output, shape index: {}]  }
   0x1   :  { %11 = vsyncpa [#allocation4 + $0x1], 0  ;;  %s886_s15 = smov 0   ;;  %s888_s16 = smov 0  }
   0x2   :  { %s890_s17 = smov 0   ;;  %s892_s18 = smov 0  }
   0x3   :  { %s894_s19 = smov 0   ;;  %s896_s20 = smov 0  }
   0x4 LB: > { %s673_s21 = sadd.s32 4294967295, %s853_s20   ;;  %s674_s22 = sadd.s32 4294967294, %s853_s20   ;;  %s853_s20 = sphi %s896_s20, %s17_s20   ;;  %s849_s19 = sphi %s894_s19, %s1070_s19   ;;  %s845_s18 = sphi %s892_s18, %s1069_s18   ;;  %s841_s17 = sphi %s890_s17, %s1068_s17   ;;  %s837_s16 = sphi %s888_s16, %s1067_s16   ;;  %s833_s15 = sphi %s886_s15, %s1066_s15  }
   0x5   : > { %s29_s23 = sadd.s32 1, %s849_s19  ;;  %s144_s24 = sadd.s32 1, %s841_s17 }
   0x6   : > { %p31_p0 = scmp.ge.s32.totalorder %s29_s23, 2  ;;  %p154_p1 = scmp.ne.s32.totalorder %s841_s17, %s837_s16 }
   0x7   : > { %p155_p2 = scmp.eq.s32.totalorder %s673_s21, 1  ;;  %p160_p3 = scmp.ne.s32.totalorder %s837_s16, %s833_s15 }
   0x8   : > { %s1072_s23 = smov (%p31_p0, %s29_s23), 0  ;;  %p161_p5 = scmp.eq.s32.totalorder %s674_s22, 1 }
   0x9   : > { %p926_p4 = por %p155_p2, %p154_p1  ;;  %s139_s26 = ssub.s32 %s849_s19, %s1072_s23 }
   0xa   : > { %p679_p6 = scmp.ge.s32.totalorder %s853_s20, 1  ;;  %p142_p7 = scmp.eq.s32.totalorder %s139_s26, 0 }
   0xb   : > { %p933_p8 = por %p161_p5, %p160_p3  ;;  %p219_p9 = scmp.lt.s32.totalorder %s853_s20, 3 }
   0xc   : > { %s939_s28 = scalar_select %p142_p7, %s841_s17, %s144_s24  }
   0xd   : > { %p220_p10 = pnand %p679_p6, %p219_p9 }
   0xe   : > { %p265_p11 = scmp.lt.s32.totalorder (!%p220_p10), %s845_s18, 1  ;;  %v855_v0 = vmov (!%p220_p10), 0   ;;  %s856_s8 = smov (!%p220_p10), 1   ;;  %v420_v29 = vld [vmem:[%s1062_s3 + $0x8] sm:$0xff] (!%p220_p10)  ;;  %v419_v30 = vld [vmem:[%s1062_s3] sm:$0xff] (!%p220_p10)  ;;  %v421_v31 = vld [vmem:[%s1062_s3 + $0x10] sm:$0xff] (!%p220_p10) }
   0xf   : > { %223 = sbr.rel (%p220_p10) target bundleno = 422 (0x1a6), region = 36  ;;  %335 = vst [vmem:[#allocation2] sm:$0xff] (!%p220_p10), %v855_v0  ;;  %337 = vst [vmem:[#allocation2 + $0x10] sm:$0xff] (!%p220_p10), %v855_v0  ;;  %487 = vmatprep.mubr.bf16.mxu0 (!%p220_p10), %v855_v0  ;;  %497 = vmatprep.mubr.bf16.mxu1 (!%p220_p10), %v855_v0  ;;  %s857_s9 = smov (!%p220_p10), 127   ;;  %v422_v32 = vld [vmem:[%s1062_s3 + $0x18] sm:$0xff] (!%p220_p10)  ;;  %vm370_vm8 = vcmask (!%p220_p10), 1047560  }
  0x10   : > { %344 = vst [vmem:[#allocation2 + $0x48] sm:$0xff] (!%p220_p10), %v855_v0  ;;  %346 = vst [vmem:[#allocation2 + $0x58] sm:$0xff] (!%p220_p10), %v855_v0  ;;  %772 = vset.pattern.permute.xlu1 (!%p220_p10), %v855_v0  ;;  %771 = vset.pattern.permute.xlu0 (!%p220_p10), %v855_v0  ;;  %vm363_vm9 = vcmask (!%p220_p10), 7168   ;;  %vm387_vm10 = vcmask (!%p220_p10), 1039360   ;;  %v773_v49 = vld [vmem:[%s1061_s2] sm:$0xff] (!%p220_p10)   ;;  %v774_v50 = vld [vmem:[%s1061_s2 + $0x8] sm:$0xff] (!%p220_p10)  }
  0x11   : > { %s858_s26 = smov (!%p220_p10), [#allocation3]  }
  0x12   : > { %s779_s5 = sshll.u32 (!%p220_p10), %s858_s26, 4  ;;  %s780_s5 = int_to_ptr.vmem [resolvable:$false] %s779_s5 }
  0x13   : > { %s781_s6 = scalar_lea.vmem (!%p220_p10), %s780_s5, 2048 }
  0x16   : > { %s949_s29 = scalar_select %p265_p11, %s845_s18, 1 }
  0x18   : > { %s692_s30 = sshll.u32 %s949_s29, 6  ;;  %s694_s29 = sshll.u32 %s845_s18, 10 }
  0x19   : > { %s269_s7 = scalar_lea.vmem %s1059_s0, %s692_s30  ;;  %s279_s11 = scalar_lea.vmem %s1060_s1, %s692_s30 }
  0x1a   : > { %v303_v1 = vld [vmem:[%s269_s7 + $0x20] sm:$0xff]  ;;  %v305_v2 = vld [vmem:[%s269_s7 + $0x30] sm:$0xff]  ;;  %v304_v8 = vld [vmem:[%s269_s7 + $0x28] sm:$0xff]  ;;  %s1007_s21 = scalar_lea.hbm %s1063_s4, %s694_s29 }
  0x1b   : > { %v299_v3 = vld [vmem:[%s269_s7] sm:$0xff]  ;;  %vm311_vm0 = vcmp.ge.f32.partialorder %v303_v1, 0.0  ;;  %vm313_vm1 = vcmp.ge.f32.partialorder %v305_v2, 0.0  ;;  %v319_v4 = vmul.f32 0.1, %v303_v1  ;;  %v301_v6 = vld [vmem:[%s269_s7 + $0x10] sm:$0xff] }
  0x1c   : > { %v321_v5 = vmul.f32 0.1, %v305_v2  ;;  %vm307_vm2 = vcmp.ge.f32.partialorder %v299_v3, 0.0  ;;  %v315_v7 = vmul.f32 0.1, %v299_v3  ;;  %v306_v9 = vld [vmem:[%s269_s7 + $0x38] sm:$0xff] }
  0x1d   : > { %v327_v10 = vsel %vm311_vm0, %v303_v1, %v319_v4  ;;  %vm309_vm3 = vcmp.ge.f32.partialorder %v301_v6, 0.0  ;;  %v317_v12 = vmul.f32 0.1, %v301_v6  ;;  %v300_v13 = vld [vmem:[%s269_s7 + $0x8] sm:$0xff]  ;;  %v302_v14 = vld [vmem:[%s269_s7 + $0x18] sm:$0xff]  ;;  %vm312_vm4 = vcmp.ge.f32.partialorder %v304_v8, 0.0 }
  0x1e   : > { %v329_v11 = vsel %vm313_vm1, %v305_v2, %v321_v5  ;;  %v323_v16 = vsel %vm307_vm2, %v299_v3, %v315_v7  ;;  %vm314_vm5 = vcmp.ge.f32.partialorder %v306_v9, 0.0  ;;  %v320_v18 = vmul.f32 0.1, %v304_v8  ;;  %v508_v56 = vld [vmem:[%s279_s11] sm:$0xff]  ;;  %v509_v62 = vld [vmem:[%s279_s11 + $0x8] sm:$0xff]  ;;  %v510_v4 = vld [vmem:[%s279_s11 + $0x10] sm:$0xff] }
  0x1f   : > { %v959_v15 = vpack.c.bf16 %v329_v11, %v327_v10  ;;  %v325_v17 = vsel %vm309_vm3, %v301_v6, %v317_v12  ;;  %v322_v19 = vmul.f32 0.1, %v306_v9  ;;  %vm308_vm6 = vcmp.ge.f32.partialorder %v300_v13, 0.0  ;;  %v512_v58 = vld [vmem:[%s279_s11 + $0x20] sm:$0xff]  ;;  %v514_v6 = vld [vmem:[%s279_s11 + $0x30] sm:$0xff]  ;;  %v511_v12 = vld [vmem:[%s279_s11 + $0x18] sm:$0xff] }
  0x20   : > { %v331_v20 = vpack.c.bf16 %v325_v17, %v323_v16  ;;  %vm310_vm7 = vcmp.ge.f32.partialorder %v302_v14, 0.0  ;;  %v316_v21 = vmul.f32 0.1, %v300_v13  ;;  %v318_v22 = vmul.f32 0.1, %v302_v14 }
  0x21   : > { %359 = vrot.lane.b32.xlu1 %v959_v15, %s856_s8  ;;  %v328_v23 = vsel %vm312_vm4, %v304_v8, %v320_v18  ;;  %v330_v24 = vsel %vm314_vm5, %v306_v9, %v322_v19 }
  0x22   : > { %355 = vrot.lane.b32.xlu0 %v331_v20, %s856_s8  ;;  %v334_v25 = vpack.c.bf16 %v330_v24, %v328_v23  ;;  %v324_v26 = vsel %vm308_vm6, %v300_v13, %v316_v21  ;;  %v326_v27 = vsel %vm310_vm7, %v302_v14, %v318_v22  ;;  %v515_v14 = vld [vmem:[%s279_s11 + $0x38] sm:$0xff] }
  0x23   : > { %v332_v28 = vpack.c.bf16 %v326_v27, %v324_v26 }
  0x25   : > { %361 = vrot.lane.b32.xlu1 %v334_v25, %s856_s8 }
  0x26   : > { %357 = vrot.lane.b32.xlu0 %v332_v28, %s856_s8  ;;  %s262_s8 = sand.u32 1, %s837_s16  }
  0x27   : > { %s680_s12 = sshll.u32 %s262_s8, 6  ;;  %s1013_s22 = scalar_lea.sflag [#allocation4], %s262_s8 }
  0x28   : > { %s264_s30 = scalar_lea.vmem [#allocation3], %s680_s12 }
  0x29   : > { %381 = vrot.lane.b32.xlu1 %v332_v28, %s857_s9  ;;  %s549_s13 = sshll.u32 %s264_s30, 4  ;;  %s1009_s13 = int_to_ptr.vmem [resolvable:$true] %s549_s13 }
  0x2a   : > { %379 = vrot.lane.b32.xlu0 %v331_v20, %s857_s9  ;;  %s775_s24 = scalar_lea.vmem %s1009_s13, 1024  ;;  %p782_p1 = scmp.lt.s32.totalorder %s1009_s13, %s780_s5 }
  0x2b   : > { %p776_p12 = scmp.ne.s32.totalorder %s1009_s13, %s775_s24  ;;  %p783_p2 = scmp.lt.s32.totalorder %s781_s6, %s775_s24 }
  0x2d   : > { %385 = vrot.lane.b32.xlu1 %v334_v25, %s857_s9  ;;  %p777_p13 = pnand %p776_p12, %p926_p4  ;;  %p784_p3 = por %p783_p2, %p782_p1 }
  0x2e   : > { %383 = vrot.lane.b32.xlu0 %v959_v15, %s857_s9 }
  0x2f   : > { %p778_p0 = pneg %p777_p13 }
  0x31   : > { %430 = vperm.xlu1 %772, %v420_v29   ;;  %p785_p5 = pnand %p784_p3, %p778_p0 }
  0x32   : > { %425 = vperm.xlu0 %771, %v419_v30  }
  0x35   : > { %435 = vperm.xlu1 %772, %v421_v31  }
  0x36   : > { %440 = vperm.xlu0 %771, %v422_v32  }
  0x93   : > { %v360_v33 = vpop.permute.xlu1 %359 }
  0x94   : > { %373 = vst.msk [vmem:[#allocation2 + $0x10] sm:$0xff] %vm370_vm8, %v360_v33  ;;  %v356_v34 = vpop.permute.xlu0 %355 }
  0x95   : > { %371 = vst.msk [vmem:[#allocation2] sm:$0xff] %vm370_vm8, %v356_v34 }
  0x97   : > { %v362_v35 = vpop.permute.xlu1 %361 }
  0x98   : > { %v365_v36 = vsel %vm363_vm9, %v360_v33, %v362_v35  ;;  %v358_v37 = vpop.permute.xlu0 %357 }
  0x99   : > { %v364_v38 = vsel %vm363_vm9, %v356_v34, %v358_v37 }
  0x9a   : > { %455 = vmatprep.subr.bf16.mxu0 %v364_v38  ;;  %695 = vmatprep.subr.bf16.mxu1 %v364_v38 }
  0x9b   : > { %v382_v39 = vpop.permute.xlu1 %381  ;;  %v405_v43 = vld [vmem:[#allocation2 + $0x10] sm:$0xff] }
  0x9c   : > { %396 = vst.msk [vmem:[#allocation2 + $0x48] sm:$0xff] %vm387_vm10, %v382_v39  ;;  %v403_v40 = vld [vmem:[#allocation2] sm:$0xff]  ;;  %v380_v41 = vpop.permute.xlu0 %379 }
  0x9d   : > { %456 = vmatpush1.bf16.msra.mxu0 %v403_v40  ;;  %703 = vmatpush1.bf16.msra.mxu1 %v403_v40  ;;  %v388_v42 = vsel %vm387_vm10, %v380_v41, %v382_v39 }
  0x9e   : > { %457 = vmatprep.subr.bf16.mxu0 %v365_v36  ;;  %696 = vmatprep.subr.bf16.mxu1 %v365_v36 }
  0x9f   : > { %v386_v44 = vpop.permute.xlu1 %385 }
  0xa0   : > { %398 = vst.msk [vmem:[#allocation2 + $0x58] sm:$0xff] %vm387_vm10, %v386_v44  ;;  %v384_v45 = vpop.permute.xlu0 %383 }
  0xa1   : > { %458 = vmatpush1.bf16.msra.mxu0 %v405_v43  ;;  %704 = vmatpush1.bf16.msra.mxu1 %v405_v43  ;;  %v389_v46 = vsel %vm387_vm10, %v384_v45, %v386_v44 }
  0xa2   : > { %459 = vmatprep.subr.bf16.mxu0 %v332_v28  ;;  %697 = vmatprep.subr.bf16.mxu1 %v332_v28 }
  0xa3   : > { %v412_v47 = vld [vmem:[#allocation2 + $0x48] sm:$0xff] }
  0xa5   : > { %460 = vmatpush1.bf16.msra.mxu0 %v331_v20  ;;  %705 = vmatpush1.bf16.msra.mxu1 %v331_v20 }
  0xa6   : > { %461 = vmatprep.subr.bf16.mxu0 %v334_v25  ;;  %698 = vmatprep.subr.bf16.mxu1 %v334_v25 }
  0xa7   : > { %v414_v48 = vld [vmem:[#allocation2 + $0x58] sm:$0xff] }
  0xa9   : > { %462 = vmatpush1.bf16.msra.mxu0 %v959_v15  ;;  %706 = vmatpush1.bf16.msra.mxu1 %v959_v15 }
  0xaa   : > { %463 = vmatprep.subr.bf16.mxu0 %v412_v47  ;;  %699 = vmatprep.subr.bf16.mxu1 %v412_v47 }
  0xad   : > { %464 = vmatpush1.bf16.msra.mxu0 %v388_v42  ;;  %707 = vmatpush1.bf16.msra.mxu1 %v388_v42 }
  0xae   : > { %465 = vmatprep.subr.bf16.mxu0 %v414_v48  ;;  %700 = vmatprep.subr.bf16.mxu1 %v414_v48 }
  0xb0   : > { %v431_v51 = vpop.permute.xlu1 %430 }
  0xb1   : > { %466 = vmatpush1.bf16.msra.mxu0 %v389_v46  ;;  %708 = vmatpush1.bf16.msra.mxu1 %v389_v46  ;;  %v426_v52 = vpop.permute.xlu0 %425 }
  0xb2   : > { %467 = vmatprep.subr.bf16.mxu0 %v855_v0  ;;  %701 = vmatprep.subr.bf16.mxu1 %v855_v0 }
  0xb4   : > { %v436_v53 = vpop.permute.xlu1 %435 }
  0xb5   : > { %468 = vmatpush1.bf16.msra.mxu0 %v855_v0  ;;  %709 = vmatpush1.bf16.msra.mxu1 %v855_v0  ;;  %v441_v54 = vpop.permute.xlu0 %440 }
  0xb6   : > { %469 = vmatprep.subr.bf16.mxu0 %v855_v0  ;;  %702 = vmatprep.subr.bf16.mxu1 %v855_v0 }
  0xb9   : > { %470 = vmatpush1.bf16.msra.mxu0 %v855_v0  ;;  %710 = vmatpush1.bf16.msra.mxu1 %v855_v0  ;;  %v513_v0 = vld [vmem:[%s279_s11 + $0x28] sm:$0xff] }
  0xbc   : > { %488 = vmatmul.mubr.bf16.vlgmr.msra.gmra.mrb[0].mxu0 %v773_v49  ;;  %498 = vmatmul.mubr.bf16.vlgmr.msra.gmra.mrb[0].mxu1 %v774_v50 }
 0x18f   : > { %v489_v55 = vpop.f32.mrb[0].mxu0  ;;  %v499_v57 = vpop.f32.mrb[0].mxu1 }
 0x190   : > { %v490_v59 = vadd.f32 %v489_v55, %v426_v52  ;;  %v500_v60 = vadd.f32 %v499_v57, %v436_v53  ;;  %v491_v61 = vpop.f32.mrb[1].mxu0  ;;  %v501_v63 = vpop.f32.mrb[1].mxu1 }
 0x191   : > { %v492_v1 = vadd.f32 %v491_v61, %v426_v52  ;;  %v502_v2 = vadd.f32 %v501_v63, %v436_v53  ;;  %v493_v3 = vpop.f32.mrb[2].mxu0  ;;  %v503_v5 = vpop.f32.mrb[2].mxu1 }
 0x192   : > { %v516_v7 = vadd.f32 %v508_v56, %v490_v59  ;;  %v520_v8 = vadd.f32 %v512_v58, %v500_v60  ;;  %v494_v9 = vadd.f32 %v493_v3, %v431_v51  ;;  %v504_v10 = vadd.f32 %v503_v5, %v441_v54  ;;  %v495_v11 = vpop.f32.mrb[3].mxu0  ;;  %v505_v13 = vpop.f32.mrb[3].mxu1 }
 0x193   : > { %v517_v15 = vadd.f32 %v509_v62, %v492_v1  ;;  %v521_v16 = vadd.f32 %v513_v0, %v502_v2  ;;  %v496_v17 = vadd.f32 %v495_v11, %v431_v51  ;;  %v506_v18 = vadd.f32 %v505_v13, %v441_v54 }
 0x194   : > { %524 = vst [vmem:[%s264_s30] sm:$0xff] %v516_v7  ;;  %528 = vst [vmem:[%s264_s30 + $0x20] sm:$0xff] %v520_v8  ;;  %v518_v19 = vadd.f32 %v510_v4, %v494_v9  ;;  %v522_v20 = vadd.f32 %v514_v6, %v504_v10 }
 0x195   : > { %525 = vst [vmem:[%s264_s30 + $0x8] sm:$0xff] %v517_v15  ;;  %529 = vst [vmem:[%s264_s30 + $0x28] sm:$0xff] %v521_v16  ;;  %v519_v21 = vadd.f32 %v511_v12, %v496_v17  ;;  %v523_v22 = vadd.f32 %v515_v14, %v506_v18 }
 0x196   : > { %526 = vst [vmem:[%s264_s30 + $0x10] sm:$0xff] %v518_v19  ;;  %530 = vst [vmem:[%s264_s30 + $0x30] sm:$0xff] %v522_v20 }
 0x197   : > { %527 = vst [vmem:[%s264_s30 + $0x18] sm:$0xff] %v519_v21  ;;  %531 = vst [vmem:[%s264_s30 + $0x38] sm:$0xff] %v523_v22 }
 0x198   : > { %788 = shalt.err (!%p785_p5)
}
 0x199   : > { %s789_s7 = scalar_lea.hbm %s1007_s21, 1024  ;;  %s793_s10 = scalar_lea.hbm %s1063_s4, 2048 }
 0x19a   : > { %p790_p6 = scmp.ne.s32.totalorder %s1007_s21, %s789_s7  ;;  %p794_p10 = scmp.lt.u32.totalorder %s1007_s21, %s1063_s4 }
 0x19b   : > { %p795_p11 = scmp.lt.u32.totalorder %s793_s10, %s789_s7  ;;  %p797_p13 = scmp.lt.u32.totalorder %s789_s7, %s1007_s21 }
 0x19c   : > { %p791_p7 = pnand %p790_p6, %p926_p4 }
 0x19d   : > { %p796_p12 = por %p795_p11, %p794_p10 }
 0x19e   : > { %p792_p9 = pneg %p791_p7 }
 0x19f   : > { %p798_p0 = por %p797_p13, %p796_p12 }
 0x1a1   : > { %p799_p1 = pnand %p798_p0, %p792_p9 }
 0x1a3   : > { %802 = shalt.err (!%p799_p1)
}
 0x1a4   : > { %s859_s29 = smov 256   ;;  %s860_s30 = smov 16  }
 0x1a5   : > { %711 = dma.vmem_to_hbm [thread:$0]  (%p926_p4), %s1009_s13, 1024, %s1007_s21, %s1013_s22, %s859_s29, %s859_s29, %s860_s30  }
 0x1a6 PF: > { %p717_p2 = scmp.ge.s32.totalorder %s853_s20, 2  ;;  %s564_s18 = sand.u32 1, %s833_s15  }
 0x1a7   : > { %s565_s14 = scalar_lea.sflag [#allocation4], %s564_s18 }
 0x1a8   : > { %p714_p3 = pnand %p717_p2, %p933_p8 }
 0x1aa   : > { %828 = dma.done.wait (!%p714_p3), %s565_s14, 1024  }
 0x1ab   : > { %830 = vsyncadd (!%p714_p3), %s565_s14, 4294966272  ;;  %s17_s20 = sadd.s32 1, %s853_s20   ;;  %s1066_s15 = smov %s837_s16 }
 0x1ac   : > { %p14_p5 = scmp.ge.s32.totalorder %s17_s20, 4   ;;  %s1067_s16 = smov %s841_s17 }
 0x1ad   : > { %s1068_s17 = smov %s939_s28  ;;  %s1069_s18 = smov %s849_s19 }
 0x1ae   : > { %s1070_s19 = smov %s1072_s23  ;;  %16 = sbr.rel (!%p14_p5) target bundleno = 4 (0x4), region = 84 }
 0x1b5   :  { %570 = vsyncpa [#allocation4], 1 }
 0x1b6   :  { %572 = vsyncpa [#allocation4 + $0x1], 1 }

</bundles_post_ra>
